<compile_context>
chip_gen: v7x
topology: tpu7x:2x2x1
jax: 0.10.0
libtpu: 0.0.40
codegen_flags: <defaults>
</compile_context>

<pallas_src>
import functools

import jax
import jax.numpy as jnp
from jax import lax
from jax.experimental import pallas as pl
from jax.experimental.pallas import tpu as pltpu

# 48 MiB scoped VMEM: above the 32 MiB default, below v7x's ~56 MiB usable ceiling so the same
# setting is safe on v5e / v6e / v7x.
_VMEM_LIMIT = 48 * 1024 * 1024

# Finite "-inf" for the per-destination max so that 0 * max never produces NaN.
_NEG_LARGE = -1e30


def _pick_tile(n, candidates):
    for c in candidates:
        if n % c == 0:
            return c
    return n


# ----------------------------------------------------------------------------------------
# Kernel 1: fused node projections [k | q]
# ----------------------------------------------------------------------------------------
def proj_kernel(atom_ref, wkq_ref, bkq_ref, k_ref, q_ref):
    f32 = jnp.float32
    hidden = k_ref.shape[-1]
    kq = jnp.dot(atom_ref[...], wkq_ref[...], preferred_element_type=f32) + bkq_ref[...]
    k_ref[...] = kq[:, :hidden]
    q_ref[...] = kq[:, hidden:]


def node_projections(atom, wkq, bkq, *, tile_n):
    N, hidden = atom.shape
    row = lambda i: (i, 0)
    full = lambda i: (0, 0)
    return pl.pallas_call(
        proj_kernel,
        grid=(N // tile_n,),
        in_specs=[
            pl.BlockSpec((tile_n, hidden), row),
            pl.BlockSpec((hidden, 2 * hidden), full),
            pl.BlockSpec((1, 2 * hidden), full),
        ],
        out_specs=[
            pl.BlockSpec((tile_n, hidden), row),
            pl.BlockSpec((tile_n, hidden), row),
        ],
        out_shape=[
            jax.ShapeDtypeStruct((N, hidden), jnp.float32),
            jax.ShapeDtypeStruct((N, hidden), jnp.float32),
        ],
        compiler_params=pltpu.CompilerParams(
            dimension_semantics=("parallel",), vmem_limit_bytes=_VMEM_LIMIT),
    )(atom, wkq, bkq)


# ----------------------------------------------------------------------------------------
# Kernel 2: edge aggregation (attention + per-destination softmax + segment-sum)
#   grid = (pass, edge_tile); pass 0: logits + scatter-max, pass 1: exp + fused scatter matmul.
# ----------------------------------------------------------------------------------------
def _gather_rows(table, idx, vector_gather):
    """Gather rows table[idx] for a (rows, lanes) VMEM-resident table."""
    if vector_gather:
        return jnp.take(table, idx, axis=0, mode="clip")
    # Fallback only (used if jnp.take row-gather does not lower): one-hot MXU gather.
    n = table.shape[0]
    oh = (idx[:, None] ==
          lax.broadcasted_iota(jnp.int32, (idx.shape[0], n), 1)).astype(table.dtype)
    return jnp.dot(oh, table, preferred_element_type=jnp.float32)


def edge_kernel(dst_smem,                                   # scalar-prefetch (SMEM, (E,))
                srcv_ref, dstv_ref,                         # (1, tile_e) int32 index vectors
                k_ref, q_ref, attm_ref, dist_ref, bond_ref, doh_ref,
                ft_ref,
                lg_all, node_max, acc,
                *, vector_gather):
    f32 = jnp.float32
    hidden = ft_ref.shape[-1]
    p = pl.program_id(0)                    # pass index (0: logits+max, 1: accumulate)
    t = pl.program_id(1)                    # edge-tile index
    n_tiles = pl.num_programs(1)
    tile_e = srcv_ref.shape[-1]
    base = pl.multiple_of(t * tile_e, tile_e)

    @pl.when(jnp.logical_and(p == 0, t == 0))
    def _init():
        node_max[...] = jnp.full(node_max.shape, _NEG_LARGE, node_max.dtype)
        acc[...] = jnp.zeros(acc.shape, acc.dtype)

    @pl.when(p == 0)
    def _logits_and_scatter_max():
        # Vectorized row gathers of k[src] and q[dst] (head-broadcast layout, lane-dense).
        ke = _gather_rows(k_ref[...], srcv_ref[0, :], vector_gather)
        qe = _gather_rows(q_ref[...], dstv_ref[0, :], vector_gather)
        e = ke + qe
        e = jnp.where(e > 0, e, 0.01 * e)                  # LeakyReLU(0.01)
        # Head-broadcast logits: lg[r, h*D+j] = sum_d leaky(e)[r, h*D+d] * attn[h, d]  (all j)
        logits = jnp.dot(e, attm_ref[...], preferred_element_type=f32) + dist_ref[...]
        lg_all[pl.ds(base, tile_e), :] = logits            # persist for pass 1 (no recompute)

        # Per-destination scatter-max (DGL edge_softmax semantics). Inherently serial RMW;
        # unroll=8 gives the scheduler visibility and lets the dst SMEM reads hoist ahead of
        # the single-row read-modify-write stores.
        def _smax(i, carry):
            d = dst_smem[base + i]
            node_max[pl.ds(d, 1), :] = jnp.maximum(
                node_max[pl.ds(d, 1), :], lg_all[pl.ds(base + i, 1), :])
            return carry
        lax.fori_loop(0, tile_e, _smax, 0, unroll=8)

    @pl.when(p == 1)
    def _accumulate():
        lg = lg_all[pl.ds(base, tile_e), :]
        gm = _gather_rows(node_max[...], dstv_ref[0, :], vector_gather)
        ex = jnp.exp(lg - gm)                              # (tile_e, hidden), head-broadcast
        # Fused scatter matmul: one (N, tile_e) x (tile_e, 2*hidden) MXU op for [denom | ft].
        cat = jnp.concatenate([ex, bond_ref[...] * ex], axis=-1)
        acc[...] += jnp.dot(doh_ref[...].astype(f32), cat, preferred_element_type=f32)

    @pl.when(jnp.logical_and(p == 1, t == n_tiles - 1))
    def _finalize():
        den = acc[:, :hidden]
        ft = acc[:, hidden:]
        safe = jnp.where(den > 0, den, 1.0)
        # Denominator is constant per destination -> normalize after aggregation; nodes with
        # no incoming edges get ft = 0 (matches fn.sum over an empty set).
        ft_ref[...] = jnp.where(den > 0, ft / safe, 0.0)


def edge_aggregate(k, q, bond, dist, src, dst, attm, dst_oh_t, *, tile_e, vector_gather):
    N, hidden = k.shape
    E = bond.shape[0]
    n_tiles = E // tile_e
    src_vec = src.reshape(1, E)
    dst_vec = dst.reshape(1, E)

    grid_spec = pltpu.PrefetchScalarGridSpec(
        num_scalar_prefetch=1,
        grid=(2, n_tiles),
        in_specs=[
            # Pass-dependent index maps: streams consumed only in one pass revisit block 0 in
            # the other pass (no wasted HBM traffic).
            pl.BlockSpec((1, tile_e), lambda p, t, *_: (0, t * (1 - p))),   # src (pass 0)
            pl.BlockSpec((1, tile_e), lambda p, t, *_: (0, t)),             # dst (both passes)
            pl.BlockSpec((N, hidden), lambda p, t, *_: (0, 0)),             # k (resident)
            pl.BlockSpec((N, hidden), lambda p, t, *_: (0, 0)),             # q (resident)
            pl.BlockSpec((hidden, hidden), lambda p, t, *_: (0, 0)),        # attM (resident)
            pl.BlockSpec((tile_e, 1), lambda p, t, *_: (t * (1 - p), 0)),   # dist (pass 0)
            pl.BlockSpec((tile_e, hidden), lambda p, t, *_: (t * p, 0)),    # bond (pass 1)
            pl.BlockSpec((N, tile_e), lambda p, t, *_: (0, t * p)),         # dst one-hot (pass 1)
        ],
        out_specs=pl.BlockSpec((N, hidden), lambda p, t, *_: (0, 0)),
        scratch_shapes=[
            pltpu.VMEM((E, hidden), jnp.float32),        # persisted logits
            pltpu.VMEM((N, hidden), jnp.float32),        # per-destination max
            pltpu.VMEM((N, 2 * hidden), jnp.float32),    # fused [denominator | ft] accumulator
        ],
    )
    return pl.pallas_call(
        functools.partial(edge_kernel, vector_gather=vector_gather),
        grid_spec=grid_spec,
        out_shape=jax.ShapeDtypeStruct((N, hidden), jnp.float32),
        compiler_params=pltpu.CompilerParams(
            dimension_semantics=("arbitrary", "arbitrary"),
            vmem_limit_bytes=_VMEM_LIMIT),
    )(dst, src_vec, dst_vec, k, q, attm, dist, bond, dst_oh_t)


# ----------------------------------------------------------------------------------------
# Kernel 3: node MLP (lin1/lin2 + atom residual + res1 + res2)
# ----------------------------------------------------------------------------------------
def node_mlp_kernel(ft_ref, atom_ref,
                    w1_ref, b1_ref, w2_ref, b2_ref,
                    r1w1_ref, r1b1_ref, r1w2_ref, r1b2_ref,
                    r2w1_ref, r2b1_ref, r2w2_ref, r2b2_ref,
                    out_ref):
    f32 = jnp.float32
    ft = ft_ref[...]
    h = jnp.maximum(jnp.dot(ft, w1_ref[...], preferred_element_type=f32) + b1_ref[...], 0.0)
    he = jnp.dot(h, w2_ref[...], preferred_element_type=f32) + b2_ref[...] + atom_ref[...]
    t = jnp.maximum(jnp.dot(he, r1w1_ref[...], preferred_element_type=f32) + r1b1_ref[...], 0.0)
    t = jnp.maximum(jnp.dot(t, r1w2_ref[...], preferred_element_type=f32) + r1b2_ref[...], 0.0)
    he = he + t
    t = jnp.maximum(jnp.dot(he, r2w1_ref[...], preferred_element_type=f32) + r2b1_ref[...], 0.0)
    t = jnp.maximum(jnp.dot(t, r2w2_ref[...], preferred_element_type=f32) + r2b2_ref[...], 0.0)
    out_ref[...] = he + t


def node_mlp(ft, atom, params, *, tile_n):
    N, hidden = ft.shape
    row = lambda i: (i, 0)
    full = lambda i: (0, 0)
    w_spec = pl.BlockSpec((hidden, hidden), full)
    b_spec = pl.BlockSpec((1, hidden), full)
    return pl.pallas_call(
        node_mlp_kernel,
        grid=(N // tile_n,),
        in_specs=[pl.BlockSpec((tile_n, hidden), row),
                  pl.BlockSpec((tile_n, hidden), row),
                  w_spec, b_spec, w_spec, b_spec,
                  w_spec, b_spec, w_spec, b_spec,
                  w_spec, b_spec, w_spec, b_spec],
        out_specs=pl.BlockSpec((tile_n, hidden), row),
        out_shape=jax.ShapeDtypeStruct((N, hidden), jnp.float32),
        compiler_params=pltpu.CompilerParams(
            dimension_semantics=("parallel",), vmem_limit_bytes=_VMEM_LIMIT),
    )(ft, atom,
      params["w1"], params["b1"], params["w2"], params["b2"],
      params["r1w1"], params["r1b1"], params["r1w2"], params["r1b2"],
      params["r2w1"], params["r2b1"], params["r2w2"], params["r2b2"])


# ----------------------------------------------------------------------------------------
# Forward wrapper (plain-JAX glue: block attention matrix, bf16 one-hot scatter matrix)
# ----------------------------------------------------------------------------------------
def bond2atom_forward(params, bond_embedding, atom_embedding, dist_decay, src, dst,
                      *, tile_n=None, tile_e=None):
    N, hidden = atom_embedding.shape
    E = bond_embedding.shape[0]
    H = params["num_head"]
    D = hidden // H

    if tile_n is None:
        tile_n = _pick_tile(N, (512, 256, 128))   # bigger node tiles amortize per-step overhead
    if tile_e is None:
        tile_e = _pick_tile(E, (256, 128))

    # Bounds safety: dynamic VMEM reads/writes are not bounds-checked on TPU.
    src = jnp.clip(src.astype(jnp.int32), 0, N - 1)
    dst = jnp.clip(dst.astype(jnp.int32), 0, N - 1)

    # Head-broadcast attention matrix: attm[h*D+d, g*D+j] = (h==g) * attn[h, d]
    # so that (leaky(e) @ attm)[:, g*D+j] == per-head attention score broadcast over D lanes.
    attm = (jnp.eye(H, dtype=jnp.float32)[:, None, :, None]
            * params["attn"][0][:, :, None, None]
            * jnp.ones((1, 1, 1, D), jnp.float32)).reshape(hidden, hidden)

    # Scatter (segment-sum) matrix only — 0/1 values are exact in bf16 (half the HBM stream).
    dst_oh_t = jax.nn.one_hot(dst, N, dtype=jnp.bfloat16).T      # (N, E)

    # Fused projection weights: one 256-wide matmul per node tile.
    wkq = jnp.concatenate([params["wk"], params["wq"]], axis=1)   # (hidden, 2*hidden)
    bkq = jnp.concatenate([params["bk"], params["bq"]], axis=1)   # (1, 2*hidden)

    k, q = node_projections(atom_embedding, wkq, bkq, tile_n=tile_n)

    try:
        ft = edge_aggregate(k, q, bond_embedding, dist_decay, src, dst, attm, dst_oh_t,
                            tile_e=tile_e, vector_gather=True)
        ft = jax.block_until_ready(ft)
    except Exception:
        # TODO(synk): remove once jnp.take row-gather lowering is confirmed on the target
        # jaxlib; the fallback uses in-kernel one-hot MXU gathers (correct, slower).
        ft = edge_aggregate(k, q, bond_embedding, dist_decay, src, dst, attm, dst_oh_t,
                            tile_e=tile_e, vector_gather=False)

    return node_mlp(ft, atom_embedding, params, tile_n=tile_n)


# ----------------------------------------------------------------------------------------
# Pure-JAX reference replicating the PyTorch/DGL semantics
# ----------------------------------------------------------------------------------------
def reference_forward(params, bond, atom, dist, src, dst):
    N, hidden = atom.shape
    E = bond.shape[0]
    H = params["num_head"]
    D = hidden // H

    k = atom @ params["wk"] + params["bk"]
    q = atom @ params["wq"] + params["bq"]
    e = k[src] + q[dst]
    e = jnp.where(e > 0, e, 0.01 * e).reshape(E, H, D)
    att = (e * params["attn"]).sum(-1)                           # (E, H)
    logits = att + dist                                          # (E, H)
    mx = jax.ops.segment_max(logits, dst, num_segments=N)
    ex = jnp.exp(logits - mx[dst])
    den = jax.ops.segment_sum(ex, dst, num_segments=N)
    a = ex / den[dst]
    m = bond.reshape(E, H, D) * a[..., None]
    ft = jax.ops.segment_sum(m.reshape(E, hidden), dst, num_segments=N)
    h = jnp.maximum(ft @ params["w1"] + params["b1"], 0.0)
    he = h @ params["w2"] + params["b2"] + atom
    t = jnp.maximum(he @ params["r1w1"] + params["r1b1"], 0.0)
    t = jnp.maximum(t @ params["r1w2"] + params["r1b2"], 0.0)
    he = he + t
    t = jnp.maximum(he @ params["r2w1"] + params["r2b1"], 0.0)
    t = jnp.maximum(t @ params["r2w2"] + params["r2b2"], 0.0)
    return he + t


if __name__ == "__main__":
    # Small but tile-friendly shapes: hidden = 128 (lane-dense), N = 256, E = 384 (3 edge tiles).
    N, E, hidden, H = 256, 384, 128, 4
    D = hidden // H

    key = jax.random.PRNGKey(0)
    ks = jax.random.split(key, 24)
    scale = 0.1

    def lin(i):  # weights pre-transposed (in, out), biases (1, out)
        w = scale * jax.random.normal(ks[2 * i], (hidden, hidden), jnp.float32)
        b = scale * jax.random.normal(ks[2 * i + 1], (1, hidden), jnp.float32)
        return w, b

    wk, bk = lin(0)
    wq, bq = lin(1)
    w1, b1 = lin(2)
    w2, b2 = lin(3)
    r1w1, r1b1 = lin(4)
    r1w2, r1b2 = lin(5)
    r2w1, r2b1 = lin(6)
    r2w2, r2b2 = lin(7)
    attn = scale * jax.random.normal(ks[16], (1, H, D), jnp.float32)

    params = dict(
        num_head=H, attn=attn,
        wk=wk, bk=bk, wq=wq, bq=bq,
        w1=w1, b1=b1, w2=w2, b2=b2,
        r1w1=r1w1, r1b1=r1b1, r1w2=r1w2, r1b2=r1b2,
        r2w1=r2w1, r2b1=r2b1, r2w2=r2w2, r2b2=r2b2,
    )

    bond = jax.random.normal(ks[17], (E, hidden), jnp.float32)
    atom = jax.random.normal(ks[18], (N, hidden), jnp.float32)
    dist = jax.random.uniform(ks[19], (E, 1), jnp.float32)
    src = jax.random.randint(ks[20], (E,), 0, N, dtype=jnp.int32)
    dst = jax.random.randint(ks[21], (E,), 0, N, dtype=jnp.int32)

    out = bond2atom_forward(params, bond, atom, dist, src, dst)
    out = jax.block_until_ready(out)

    ref = reference_forward(params, bond, atom, dist, src, dst)
    assert jnp.allclose(out, ref, rtol=1e-3, atol=1e-3), "mismatch vs reference"

    print("KERNEL_OK")
</pallas_src>

<mosaic_0001>
module attributes {stable_mosaic.version = 11 : i64} {
  func.func @proj_kernel(%arg0: i32, %arg1: memref<256x128xf32, #tpu.memory_space<vmem>>, %arg2: memref<128x256xf32, #tpu.memory_space<vmem>>, %arg3: memref<1x256xf32, #tpu.memory_space<vmem>>, %arg4: memref<256x128xf32, #tpu.memory_space<vmem>>, %arg5: memref<256x128xf32, #tpu.memory_space<vmem>>) attributes {dimension_semantics = [#tpu.dimension_semantics<parallel>], iteration_bounds = array<i64: 1>, scalar_prefetch = 0 : i64, scratch_operands = 0 : i64, tpu.core_type = #tpu.core_type<tc>, window_params = [{transform_indices = @transform_0, window_bounds = array<i64: 256, 128>}, {pipeline_mode = #tpu.pipeline_mode<synchronous>, transform_indices = @transform_1, window_bounds = array<i64: 128, 256>}, {pipeline_mode = #tpu.pipeline_mode<synchronous>, transform_indices = @transform_2, window_bounds = array<i64: 1, 256>}, {transform_indices = @transform_3, window_bounds = array<i64: 256, 128>}, {transform_indices = @transform_4, window_bounds = array<i64: 256, 128>}]} {
    %c0 = arith.constant 0 : index
    %c0_0 = arith.constant 0 : index
    %0 = vector.load %arg1[%c0, %c0_0] : memref<256x128xf32, #tpu.memory_space<vmem>>, vector<256x128xf32>
    %c0_1 = arith.constant 0 : index
    %c0_2 = arith.constant 0 : index
    %1 = vector.load %arg2[%c0_1, %c0_2] : memref<128x256xf32, #tpu.memory_space<vmem>>, vector<128x256xf32>
    %cst = arith.constant dense<0.000000e+00> : vector<256x256xf32>
    %2 = tpu.matmul %0, %1, %cst {dimension_numbers = #tpu.dot_dimension_numbers<[1], [0], [0], [1], [0, 0, 1, 1], [], []>} : vector<256x128xf32>, vector<128x256xf32>, vector<256x256xf32> -> vector<256x256xf32>
    %c0_3 = arith.constant 0 : index
    %c0_4 = arith.constant 0 : index
    %3 = vector.load %arg3[%c0_3, %c0_4] : memref<1x256xf32, #tpu.memory_space<vmem>>, vector<1x256xf32>
    %4 = vector.broadcast %3 : vector<1x256xf32> to vector<256x256xf32>
    %5 = arith.addf %2, %4 : vector<256x256xf32>
    %6 = vector.extract_strided_slice %5 {offsets = [0, 0], sizes = [256, 128], strides = [1, 1]} : vector<256x256xf32> to vector<256x128xf32>
    %c0_5 = arith.constant 0 : index
    %c0_6 = arith.constant 0 : index
    %7 = vector.load %arg4[%c0_5, %c0_6] : memref<256x128xf32, #tpu.memory_space<vmem>>, vector<256x128xf32>
    tpu.vector_store %arg4[%c0_5, %c0_6], %6 {strides = array<i32>} : memref<256x128xf32, #tpu.memory_space<vmem>>, vector<256x128xf32>,
    %8 = vector.extract_strided_slice %5 {offsets = [0, 128], sizes = [256, 128], strides = [1, 1]} : vector<256x256xf32> to vector<256x128xf32>
    %c0_7 = arith.constant 0 : index
    %c0_8 = arith.constant 0 : index
    %9 = vector.load %arg5[%c0_7, %c0_8] : memref<256x128xf32, #tpu.memory_space<vmem>>, vector<256x128xf32>
    tpu.vector_store %arg5[%c0_7, %c0_8], %8 {strides = array<i32>} : memref<256x128xf32, #tpu.memory_space<vmem>>, vector<256x128xf32>,
    return
  }
  func.func @transform_0(%arg0: i32) -> (i32, i32) {
    %c0_i32 = arith.constant 0 : i32
    %c0_i32_0 = arith.constant 0 : i32
    return %arg0, %c0_i32 : i32, i32
  }
  func.func @transform_1(%arg0: i32) -> (i32, i32) {
    %c0_i32 = arith.constant 0 : i32
    %c0_i32_0 = arith.constant 0 : i32
    %c0_i32_1 = arith.constant 0 : i32
    return %c0_i32, %c0_i32_0 : i32, i32
  }
  func.func @transform_2(%arg0: i32) -> (i32, i32) {
    %c0_i32 = arith.constant 0 : i32
    %c0_i32_0 = arith.constant 0 : i32
    %c0_i32_1 = arith.constant 0 : i32
    return %c0_i32, %c0_i32_0 : i32, i32
  }
  func.func @transform_3(%arg0: i32) -> (i32, i32) {
    %c0_i32 = arith.constant 0 : i32
    %c0_i32_0 = arith.constant 0 : i32
    return %arg0, %c0_i32 : i32, i32
  }
  func.func @transform_4(%arg0: i32) -> (i32, i32) {
    %c0_i32 = arith.constant 0 : i32
    %c0_i32_0 = arith.constant 0 : i32
    return %arg0, %c0_i32 : i32, i32
  }
}

</mosaic_0001>

<bundles_post_ra>
// kernel: tpu_custom_call.1
= control target key start
LH: loop header
LB: loop body
LE: loop exit
PB: predicated region body
PF: predicated region fallthrough
CT: control target
= control target key end

     0   :  { %10 = vsyncpa [#allocation3], 0  ;;  %s831_s0 = inlined_call_operand.hbm [shape: f32[256,128], index: 0, kind: input, shape index: {}]   ;;  %s832_s1 = inlined_call_operand.hbm [shape: f32[128,256], index: 1, kind: input, shape index: {}]   ;;  %s833_s2 = inlined_call_operand.vmem [shape: f32[1,256], index: 2, kind: input, shape index: {}]   ;;  %s834_s3 = inlined_call_operand.hbm [shape: f32[256,128], index: 3, kind: output, shape index: {0}]   ;;  %s835_s4 = inlined_call_operand.hbm [shape: f32[256,128], index: 4, kind: output, shape index: {1}]  }
   0x1   :  { %11 = vsyncpa [#allocation6], 0 }
   0x2   :  { %12 = vsyncpa [#allocation4], 0 }
   0x3   :  { %13 = vsyncpa [#allocation9], 0  ;;  %s630_s15 = smov [#allocation2]   ;;  %s534_s19 = scalar_lea.hbm %s831_s0, 4096 }
   0x4   :  { %s19_s16 = sshll.u32 %s630_s15, 4  ;;  %p535_p0 = scmp.ne.s32.totalorder %s831_s0, %s534_s19  ;;  %s20_s16 = int_to_ptr.vmem [resolvable:$true] %s19_s16 }
   0x5   :  { %p538_p1 = scmp.lt.u32.totalorder %s534_s19, %s831_s0 }
   0x7   :  { %p540_p2 = pnand %p538_p1, %p535_p0 }
   0x9   :  { %543 = shalt.err (!%p540_p2)
}
   0xa   :  { %s544_s24 = scalar_lea.vmem %s20_s16, 4096  ;;  %p549_p4 = scmp.lt.s32.totalorder %s20_s16, %s20_s16 }
   0xb   :  { %p545_p3 = scmp.ne.s32.totalorder %s20_s16, %s544_s24  ;;  %p550_p5 = scmp.lt.s32.totalorder %s544_s24, %s544_s24 }
   0xd   :  { %p551_p6 = por %p550_p5, %p549_p4 }
   0xf   :  { %p552_p7 = pnand %p551_p6, %p545_p3 }
  0x11   :  { %555 = shalt.err (!%p552_p7)
}
  0x12   :  { %s631_s25 = smov 128   ;;  %s632_s26 = smov 8  }
  0x13   :  { %25 = dma.hbm_to_vmem [thread:$0]  %s831_s0, 4096, %s20_s16, [#allocation3], %s631_s25, %s631_s25, %s632_s26  }
  0x14   :  { %s633_s29 = smov [#allocation5]   ;;  %s556_s7 = scalar_lea.hbm %s832_s1, 4096 }
  0x15   :  { %s31_s30 = sshll.u32 %s633_s29, 4  ;;  %p557_p8 = scmp.ne.s32.totalorder %s832_s1, %s556_s7  ;;  %s32_s30 = int_to_ptr.vmem [resolvable:$true] %s31_s30 }
  0x16   :  { %p560_p9 = scmp.lt.u32.totalorder %s556_s7, %s832_s1 }
  0x18   :  { %p562_p10 = pnand %p560_p9, %p557_p8 }
  0x1a   :  { %565 = shalt.err (!%p562_p10)
}
  0x1b   :  { %s566_s12 = scalar_lea.vmem %s32_s30, 4096  ;;  %p571_p12 = scmp.lt.s32.totalorder %s32_s30, %s32_s30 }
  0x1c   :  { %p567_p11 = scmp.ne.s32.totalorder %s32_s30, %s566_s12  ;;  %p572_p13 = scmp.lt.s32.totalorder %s566_s12, %s566_s12 }
  0x1e   :  { %p573_p0 = por %p572_p13, %p571_p12 }
  0x20   :  { %p574_p1 = pnand %p573_p0, %p567_p11 }
  0x22   :  { %577 = shalt.err (!%p574_p1)
}
  0x23   :  { %s634_s0 = smov 256   ;;  %s635_s13 = smov 16  }
  0x24   :  { %37 = dma.hbm_to_vmem [thread:$0]  %s832_s1, 4096, %s32_s30, [#allocation6], %s634_s0, %s634_s0, %s635_s13  }
  0x25   :  { %622 = dma.done.wait [#allocation3], 4096  }
  0x26   :  { %623 = vsyncadd [#allocation3], 4294963200 }
  0x27   :  { %624 = dma.done.wait [#allocation6], 4096  }
  0x28   :  { %625 = vsyncadd [#allocation6], 4294963200  ;;  %v636_v0 = vmov 0.0   ;;  %v79_v1 = vld [vmem:[#allocation5 + $0x8] sm:$0xff]  ;;  %v81_v2 = vld [vmem:[#allocation5 + $0x18] sm:$0xff]  ;;  %s638_s18 = smov [#allocation8]  }
  0x29   :  { %186 = vmatprep.mubr.f32.mxu0 %v636_v0  ;;  %282 = vmatprep.mubr.f32.mxu1 %v636_v0  ;;  %v78_v3 = vld [vmem:[#allocation5] sm:$0xff]  ;;  %v477_v4 = vpack.c.bf16 %v81_v2, %v79_v1  ;;  %v80_v5 = vld [vmem:[#allocation5 + $0x10] sm:$0xff]  ;;  %v83_v6 = vld [vmem:[#allocation5 + $0x28] sm:$0xff]  ;;  %s460_s19 = sshll.u32 %s638_s18, 4  ;;  %s794_s19 = int_to_ptr.vmem [resolvable:$true] %s460_s19 }
  0x2a   :  { %v85_v7 = vld [vmem:[#allocation5 + $0x38] sm:$0xff]  ;;  %v479_v8 = vpack.c.bf16 %v80_v5, %v78_v3  ;;  %v82_v10 = vld [vmem:[#allocation5 + $0x20] sm:$0xff]  ;;  %v84_v11 = vld [vmem:[#allocation5 + $0x30] sm:$0xff] }
  0x2b   :  { %v481_v9 = vpack.c.bf16 %v85_v7, %v83_v6  ;;  %v87_v12 = vld [vmem:[#allocation5 + $0x48] sm:$0xff]  ;;  %478 = vmatprep.subr.bf16.mxu0 %v477_v4  ;;  %509 = vmatprep.subr.bf16.mxu1 %v477_v4  ;;  %v89_v13 = vld [vmem:[#allocation5 + $0x58] sm:$0xff]  ;;  %v483_v14 = vpack.c.bf16 %v84_v11, %v82_v10  ;;  %v86_v16 = vld [vmem:[#allocation5 + $0x40] sm:$0xff] }
  0x2c   :  { %480 = vmatpush1.bf16.msra.mxu0 %v479_v8  ;;  %517 = vmatpush1.bf16.msra.mxu1 %v479_v8  ;;  %v485_v15 = vpack.c.bf16 %v89_v13, %v87_v12  ;;  %v88_v17 = vld [vmem:[#allocation5 + $0x50] sm:$0xff]  ;;  %v91_v18 = vld [vmem:[#allocation5 + $0x68] sm:$0xff]  ;;  %v93_v19 = vld [vmem:[#allocation5 + $0x78] sm:$0xff] }
  0x2d   :  { %482 = vmatprep.subr.bf16.mxu0 %v481_v9  ;;  %510 = vmatprep.subr.bf16.mxu1 %v481_v9  ;;  %v487_v20 = vpack.c.bf16 %v88_v17, %v86_v16  ;;  %v489_v21 = vpack.c.bf16 %v93_v19, %v91_v18  ;;  %v90_v22 = vld [vmem:[#allocation5 + $0x60] sm:$0xff]  ;;  %v92_v23 = vld [vmem:[#allocation5 + $0x70] sm:$0xff]  ;;  %v95_v24 = vld [vmem:[#allocation5 + $0x88] sm:$0xff]  ;;  %v112_v18 = vlaneseq }
  0x2e   :  { %v97_v25 = vld [vmem:[#allocation5 + $0x98] sm:$0xff]  ;;  %v491_v26 = vpack.c.bf16 %v92_v23, %v90_v22  ;;  %v94_v28 = vld [vmem:[#allocation5 + $0x80] sm:$0xff]  ;;  %v96_v29 = vld [vmem:[#allocation5 + $0x90] sm:$0xff] }
  0x2f   :  { %v493_v27 = vpack.c.bf16 %v97_v25, %v95_v24  ;;  %v99_v30 = vld [vmem:[#allocation5 + $0xa8] sm:$0xff]  ;;  %v101_v31 = vld [vmem:[#allocation5 + $0xb8] sm:$0xff]  ;;  %v495_v32 = vpack.c.bf16 %v96_v29, %v94_v28  ;;  %v98_v34 = vld [vmem:[#allocation5 + $0xa0] sm:$0xff]  ;;  %v113_v19 = vshrl.u32 %v112_v18, 7 }
  0x30   :  { %484 = vmatpush1.bf16.msra.mxu0 %v483_v14  ;;  %518 = vmatpush1.bf16.msra.mxu1 %v483_v14  ;;  %v497_v33 = vpack.c.bf16 %v101_v31, %v99_v30  ;;  %v100_v35 = vld [vmem:[#allocation5 + $0xb0] sm:$0xff]  ;;  %v103_v36 = vld [vmem:[#allocation5 + $0xc8] sm:$0xff]  ;;  %v105_v37 = vld [vmem:[#allocation5 + $0xd8] sm:$0xff] }
  0x31   :  { %486 = vmatprep.subr.bf16.mxu0 %v485_v15  ;;  %511 = vmatprep.subr.bf16.mxu1 %v485_v15  ;;  %v499_v38 = vpack.c.bf16 %v100_v35, %v98_v34  ;;  %v501_v39 = vpack.c.bf16 %v105_v37, %v103_v36  ;;  %v102_v40 = vld [vmem:[#allocation5 + $0xc0] sm:$0xff]  ;;  %v104_v41 = vld [vmem:[#allocation5 + $0xd0] sm:$0xff]  ;;  %v107_v42 = vld [vmem:[#allocation5 + $0xe8] sm:$0xff]  ;;  %v118_v22 = vsub.s32 1, %v113_v19 }
  0x32   :  { %v109_v43 = vld [vmem:[#allocation5 + $0xf8] sm:$0xff]  ;;  %v503_v44 = vpack.c.bf16 %v104_v41, %v102_v40  ;;  %v106_v46 = vld [vmem:[#allocation5 + $0xe0] sm:$0xff]  ;;  %v108_v47 = vld [vmem:[#allocation5 + $0xf0] sm:$0xff] }
  0x33   :  { %v505_v45 = vpack.c.bf16 %v109_v43, %v107_v42  ;;  %v507_v48 = vpack.c.bf16 %v108_v47, %v106_v46  ;;  %v46_v49 = vld [vmem:[#allocation2] sm:$0xff]  ;;  %v47_v51 = vld [vmem:[#allocation2 + $0x8] sm:$0xff]  ;;  %v48_v53 = vld [vmem:[#allocation2 + $0x10] sm:$0xff] }
  0x34   :  { %488 = vmatpush1.bf16.msra.mxu0 %v487_v20  ;;  %519 = vmatpush1.bf16.msra.mxu1 %v487_v20  ;;  %v62_v50 = vld [vmem:[#allocation2 + $0x80] sm:$0xff]  ;;  %v63_v52 = vld [vmem:[#allocation2 + $0x88] sm:$0xff]  ;;  %v64_v54 = vld [vmem:[#allocation2 + $0x90] sm:$0xff]  ;;  %v114_v20 = vsub.s32 0, %v113_v19 }
  0x35   :  { %490 = vmatprep.subr.bf16.mxu0 %v489_v21  ;;  %512 = vmatprep.subr.bf16.mxu1 %v489_v21  ;;  %v49_v55 = vld [vmem:[#allocation2 + $0x18] sm:$0xff]  ;;  %v50_v57 = vld [vmem:[#allocation2 + $0x20] sm:$0xff]  ;;  %v51_v59 = vld [vmem:[#allocation2 + $0x28] sm:$0xff] }
  0x36   :  { %v65_v56 = vld [vmem:[#allocation2 + $0x98] sm:$0xff]  ;;  %v66_v58 = vld [vmem:[#allocation2 + $0xa0] sm:$0xff]  ;;  %v67_v60 = vld [vmem:[#allocation2 + $0xa8] sm:$0xff] }
  0x37   :  { %v52_v61 = vld [vmem:[#allocation2 + $0x30] sm:$0xff]  ;;  %v53_v63 = vld [vmem:[#allocation2 + $0x38] sm:$0xff]  ;;  %v54_v2 = vld [vmem:[#allocation2 + $0x40] sm:$0xff] }
  0x38   :  { %492 = vmatpush1.bf16.msra.mxu0 %v491_v26  ;;  %520 = vmatpush1.bf16.msra.mxu1 %v491_v26  ;;  %v68_v62 = vld [vmem:[#allocation2 + $0xb0] sm:$0xff]  ;;  %v69_v1 = vld [vmem:[#allocation2 + $0xb8] sm:$0xff]  ;;  %v70_v3 = vld [vmem:[#allocation2 + $0xc0] sm:$0xff] }
  0x39   :  { %494 = vmatprep.subr.bf16.mxu0 %v493_v27  ;;  %513 = vmatprep.subr.bf16.mxu1 %v493_v27  ;;  %v55_v4 = vld [vmem:[#allocation2 + $0x48] sm:$0xff]  ;;  %v56_v6 = vld [vmem:[#allocation2 + $0x50] sm:$0xff]  ;;  %v57_v8 = vld [vmem:[#allocation2 + $0x58] sm:$0xff] }
  0x3a   :  { %v71_v5 = vld [vmem:[#allocation2 + $0xc8] sm:$0xff]  ;;  %v72_v7 = vld [vmem:[#allocation2 + $0xd0] sm:$0xff]  ;;  %v73_v9 = vld [vmem:[#allocation2 + $0xd8] sm:$0xff] }
  0x3b   :  { %v58_v10 = vld [vmem:[#allocation2 + $0x60] sm:$0xff]  ;;  %v59_v12 = vld [vmem:[#allocation2 + $0x68] sm:$0xff]  ;;  %v60_v14 = vld [vmem:[#allocation2 + $0x70] sm:$0xff] }
  0x3c   :  { %496 = vmatpush1.bf16.msra.mxu0 %v495_v32  ;;  %521 = vmatpush1.bf16.msra.mxu1 %v495_v32  ;;  %v74_v11 = vld [vmem:[#allocation2 + $0xe0] sm:$0xff]  ;;  %v75_v13 = vld [vmem:[#allocation2 + $0xe8] sm:$0xff]  ;;  %v76_v15 = vld [vmem:[#allocation2 + $0xf0] sm:$0xff] }
  0x3d   :  { %498 = vmatprep.subr.bf16.mxu0 %v497_v33  ;;  %514 = vmatprep.subr.bf16.mxu1 %v497_v33  ;;  %v61_v16 = vld [vmem:[#allocation2 + $0x78] sm:$0xff]  ;;  %v110_v21 = vld [vmem:[%s833_s2] sm:$0x3]  ;;  %s637_s2 = smov [#allocation7]  }
  0x3e   :  { %v77_v17 = vld [vmem:[#allocation2 + $0xf8] sm:$0xff]  ;;  %v726_v23 = vrot.slane %v110_v21, %v114_v20  ;;  %v728_v24 = vrot.slane %v110_v21, %v118_v22  ;;  %s448_s17 = sshll.u32 %s637_s2, 4  ;;  %s449_s17 = int_to_ptr.vmem [resolvable:$true] %s448_s17 }
  0x3f   :  { %s578_s20 = scalar_lea.vmem %s449_s17, 4096  ;;  %p583_p3 = scmp.lt.s32.totalorder %s449_s17, %s449_s17 }
  0x40   :  { %500 = vmatpush1.bf16.msra.mxu0 %v499_v38  ;;  %522 = vmatpush1.bf16.msra.mxu1 %v499_v38  ;;  %p579_p2 = scmp.ne.s32.totalorder %s449_s17, %s578_s20  ;;  %p584_p4 = scmp.lt.s32.totalorder %s578_s20, %s578_s20 }
  0x41   :  { %502 = vmatprep.subr.bf16.mxu0 %v501_v39  ;;  %515 = vmatprep.subr.bf16.mxu1 %v501_v39 }
  0x42   :  { %p585_p5 = por %p584_p4, %p583_p3 }
  0x44   :  { %504 = vmatpush1.bf16.msra.mxu0 %v503_v44  ;;  %523 = vmatpush1.bf16.msra.mxu1 %v503_v44  ;;  %p586_p6 = pnand %p585_p5, %p579_p2 }
  0x45   :  { %506 = vmatprep.subr.bf16.mxu0 %v505_v45  ;;  %516 = vmatprep.subr.bf16.mxu1 %v505_v45 }
  0x48   :  { %508 = vmatpush1.bf16.msra.mxu0 %v507_v48  ;;  %524 = vmatpush1.bf16.msra.mxu1 %v507_v48 }
  0x4b   :  { %187 = vmatmul.mubr.f32.vlgmr.msra.gmra.mrb[0].mxu0 %v46_v49  ;;  %283 = vmatmul.mubr.f32.vlgmr.msra.gmra.mrb[0].mxu1 %v62_v50 }
  0x4c   :  { %192 = vmatprep.mubr.f32.mxu0 %v636_v0  ;;  %288 = vmatprep.mubr.f32.mxu1 %v636_v0 }
  0x4f   :  { %193 = vmatmul.mubr.f32.gmra.mrb[2].mxu0 %v47_v51  ;;  %289 = vmatmul.mubr.f32.gmra.mrb[2].mxu1 %v63_v52 }
  0x50   :  { %198 = vmatprep.mubr.f32.mxu0 %v636_v0  ;;  %294 = vmatprep.mubr.f32.mxu1 %v636_v0 }
  0x53   :  { %199 = vmatmul.mubr.f32.gmra.mrb[4].mxu0 %v48_v53  ;;  %295 = vmatmul.mubr.f32.gmra.mrb[4].mxu1 %v64_v54 }
  0x54   :  { %204 = vmatprep.mubr.f32.mxu0 %v636_v0  ;;  %300 = vmatprep.mubr.f32.mxu1 %v636_v0 }
  0x57   :  { %205 = vmatmul.mubr.f32.gmra.mrb[6].mxu0 %v49_v55  ;;  %301 = vmatmul.mubr.f32.gmra.mrb[6].mxu1 %v65_v56 }
  0x58   :  { %210 = vmatprep.mubr.f32.mxu0 %v636_v0  ;;  %306 = vmatprep.mubr.f32.mxu1 %v636_v0 }
  0x5b   :  { %211 = vmatmul.mubr.f32.gmra.mrb[8].mxu0 %v50_v57  ;;  %307 = vmatmul.mubr.f32.gmra.mrb[8].mxu1 %v66_v58 }
  0x5c   :  { %216 = vmatprep.mubr.f32.mxu0 %v636_v0  ;;  %312 = vmatprep.mubr.f32.mxu1 %v636_v0 }
  0x5f   :  { %217 = vmatmul.mubr.f32.gmra.mrb[10].mxu0 %v51_v59  ;;  %313 = vmatmul.mubr.f32.gmra.mrb[10].mxu1 %v67_v60 }
  0x60   :  { %222 = vmatprep.mubr.f32.mxu0 %v636_v0  ;;  %318 = vmatprep.mubr.f32.mxu1 %v636_v0 }
  0x63   :  { %223 = vmatmul.mubr.f32.gmra.mrb[12].mxu0 %v52_v61  ;;  %319 = vmatmul.mubr.f32.gmra.mrb[12].mxu1 %v68_v62 }
  0x64   :  { %228 = vmatprep.mubr.f32.mxu0 %v636_v0  ;;  %324 = vmatprep.mubr.f32.mxu1 %v636_v0 }
  0x67   :  { %229 = vmatmul.mubr.f32.gmra.mrb[14].mxu0 %v53_v63  ;;  %325 = vmatmul.mubr.f32.gmra.mrb[14].mxu1 %v69_v1 }
  0x68   :  { %234 = vmatprep.mubr.f32.mxu0 %v636_v0  ;;  %330 = vmatprep.mubr.f32.mxu1 %v636_v0 }
  0x6b   :  { %235 = vmatmul.mubr.f32.gmra.mrb[16].mxu0 %v54_v2  ;;  %331 = vmatmul.mubr.f32.gmra.mrb[16].mxu1 %v70_v3 }
  0x6c   :  { %240 = vmatprep.mubr.f32.mxu0 %v636_v0  ;;  %336 = vmatprep.mubr.f32.mxu1 %v636_v0 }
  0x6f   :  { %241 = vmatmul.mubr.f32.gmra.mrb[18].mxu0 %v55_v4  ;;  %337 = vmatmul.mubr.f32.gmra.mrb[18].mxu1 %v71_v5 }
  0x70   :  { %246 = vmatprep.mubr.f32.mxu0 %v636_v0  ;;  %342 = vmatprep.mubr.f32.mxu1 %v636_v0 }
  0x73   :  { %247 = vmatmul.mubr.f32.gmra.mrb[20].mxu0 %v56_v6  ;;  %343 = vmatmul.mubr.f32.gmra.mrb[20].mxu1 %v72_v7 }
  0x74   :  { %252 = vmatprep.mubr.f32.mxu0 %v636_v0  ;;  %348 = vmatprep.mubr.f32.mxu1 %v636_v0 }
  0x77   :  { %253 = vmatmul.mubr.f32.gmra.mrb[22].mxu0 %v57_v8  ;;  %349 = vmatmul.mubr.f32.gmra.mrb[22].mxu1 %v73_v9 }
  0x78   :  { %258 = vmatprep.mubr.f32.mxu0 %v636_v0  ;;  %354 = vmatprep.mubr.f32.mxu1 %v636_v0 }
  0x7b   :  { %259 = vmatmul.mubr.f32.gmra.mrb[24].mxu0 %v58_v10  ;;  %355 = vmatmul.mubr.f32.gmra.mrb[24].mxu1 %v74_v11 }
  0x7c   :  { %264 = vmatprep.mubr.f32.mxu0 %v636_v0  ;;  %360 = vmatprep.mubr.f32.mxu1 %v636_v0 }
  0x7f   :  { %265 = vmatmul.mubr.f32.gmra.mrb[26].mxu0 %v59_v12  ;;  %361 = vmatmul.mubr.f32.gmra.mrb[26].mxu1 %v75_v13 }
  0x80   :  { %270 = vmatprep.mubr.f32.mxu0 %v636_v0  ;;  %366 = vmatprep.mubr.f32.mxu1 %v636_v0 }
  0x83   :  { %271 = vmatmul.mubr.f32.gmra.mrb[28].mxu0 %v60_v14  ;;  %367 = vmatmul.mubr.f32.gmra.mrb[28].mxu1 %v76_v15 }
  0x84   :  { %276 = vmatprep.mubr.f32.mxu0 %v636_v0  ;;  %372 = vmatprep.mubr.f32.mxu1 %v636_v0 }
  0x87   :  { %277 = vmatmul.mubr.f32.gmra.mrb[30].mxu0 %v61_v16  ;;  %373 = vmatmul.mubr.f32.gmra.mrb[30].mxu1 %v77_v17 }
 0x11e   :  { %v188_v25 = vpop.f32.mrb[0].mxu0  ;;  %v284_v26 = vpop.f32.mrb[0].mxu1 }
 0x11f   :  { %v189_v0 = vadd.f32 %v188_v25, %v726_v23  ;;  %v285_v27 = vadd.f32 %v284_v26, %v726_v23  ;;  %v190_v28 = vpop.f32.mrb[1].mxu0  ;;  %v286_v29 = vpop.f32.mrb[1].mxu1 }
 0x120   :  { %v191_v30 = vadd.f32 %v190_v28, %v728_v24  ;;  %v287_v31 = vadd.f32 %v286_v29, %v728_v24 }
 0x121   :  { %379 = vst [vmem:[#allocation7] sm:$0xff] %v189_v0  ;;  %395 = vst [vmem:[#allocation7 + $0x80] sm:$0xff] %v285_v27 }
 0x122   :  { %411 = vst [vmem:[#allocation8] sm:$0xff] %v191_v30  ;;  %427 = vst [vmem:[#allocation8 + $0x80] sm:$0xff] %v287_v31  ;;  %v194_v32 = vpop.f32.mrb[2].mxu0  ;;  %v290_v33 = vpop.f32.mrb[2].mxu1 }
 0x123   :  { %v195_v34 = vadd.f32 %v194_v32, %v726_v23  ;;  %v291_v35 = vadd.f32 %v290_v33, %v726_v23  ;;  %v196_v36 = vpop.f32.mrb[3].mxu0  ;;  %v292_v37 = vpop.f32.mrb[3].mxu1 }
 0x124   :  { %v197_v38 = vadd.f32 %v196_v36, %v728_v24  ;;  %v293_v39 = vadd.f32 %v292_v37, %v728_v24 }
 0x125   :  { %380 = vst [vmem:[#allocation7 + $0x8] sm:$0xff] %v195_v34  ;;  %396 = vst [vmem:[#allocation7 + $0x88] sm:$0xff] %v291_v35 }
 0x126   :  { %412 = vst [vmem:[#allocation8 + $0x8] sm:$0xff] %v197_v38  ;;  %428 = vst [vmem:[#allocation8 + $0x88] sm:$0xff] %v293_v39  ;;  %v200_v40 = vpop.f32.mrb[4].mxu0  ;;  %v296_v41 = vpop.f32.mrb[4].mxu1 }
 0x127   :  { %v201_v42 = vadd.f32 %v200_v40, %v726_v23  ;;  %v297_v43 = vadd.f32 %v296_v41, %v726_v23  ;;  %v202_v44 = vpop.f32.mrb[5].mxu0  ;;  %v298_v45 = vpop.f32.mrb[5].mxu1 }
 0x128   :  { %v203_v46 = vadd.f32 %v202_v44, %v728_v24  ;;  %v299_v47 = vadd.f32 %v298_v45, %v728_v24 }
 0x129   :  { %381 = vst [vmem:[#allocation7 + $0x10] sm:$0xff] %v201_v42  ;;  %397 = vst [vmem:[#allocation7 + $0x90] sm:$0xff] %v297_v43 }
 0x12a   :  { %413 = vst [vmem:[#allocation8 + $0x10] sm:$0xff] %v203_v46  ;;  %429 = vst [vmem:[#allocation8 + $0x90] sm:$0xff] %v299_v47  ;;  %v206_v48 = vpop.f32.mrb[6].mxu0  ;;  %v302_v49 = vpop.f32.mrb[6].mxu1 }
 0x12b   :  { %v207_v50 = vadd.f32 %v206_v48, %v726_v23  ;;  %v303_v51 = vadd.f32 %v302_v49, %v726_v23  ;;  %v208_v52 = vpop.f32.mrb[7].mxu0  ;;  %v304_v53 = vpop.f32.mrb[7].mxu1 }
 0x12c   :  { %v209_v54 = vadd.f32 %v208_v52, %v728_v24  ;;  %v305_v55 = vadd.f32 %v304_v53, %v728_v24 }
 0x12d   :  { %382 = vst [vmem:[#allocation7 + $0x18] sm:$0xff] %v207_v50  ;;  %398 = vst [vmem:[#allocation7 + $0x98] sm:$0xff] %v303_v51 }
 0x12e   :  { %414 = vst [vmem:[#allocation8 + $0x18] sm:$0xff] %v209_v54  ;;  %430 = vst [vmem:[#allocation8 + $0x98] sm:$0xff] %v305_v55  ;;  %v212_v56 = vpop.f32.mrb[8].mxu0  ;;  %v308_v57 = vpop.f32.mrb[8].mxu1 }
 0x12f   :  { %v213_v58 = vadd.f32 %v212_v56, %v726_v23  ;;  %v309_v59 = vadd.f32 %v308_v57, %v726_v23  ;;  %v214_v60 = vpop.f32.mrb[9].mxu0  ;;  %v310_v61 = vpop.f32.mrb[9].mxu1 }
 0x130   :  { %v215_v62 = vadd.f32 %v214_v60, %v728_v24  ;;  %v311_v63 = vadd.f32 %v310_v61, %v728_v24 }
 0x131   :  { %383 = vst [vmem:[#allocation7 + $0x20] sm:$0xff] %v213_v58  ;;  %399 = vst [vmem:[#allocation7 + $0xa0] sm:$0xff] %v309_v59 }
 0x132   :  { %415 = vst [vmem:[#allocation8 + $0x20] sm:$0xff] %v215_v62  ;;  %431 = vst [vmem:[#allocation8 + $0xa0] sm:$0xff] %v311_v63  ;;  %v218_v1 = vpop.f32.mrb[10].mxu0  ;;  %v314_v2 = vpop.f32.mrb[10].mxu1 }
 0x133   :  { %v219_v3 = vadd.f32 %v218_v1, %v726_v23  ;;  %v315_v4 = vadd.f32 %v314_v2, %v726_v23  ;;  %v220_v5 = vpop.f32.mrb[11].mxu0  ;;  %v316_v6 = vpop.f32.mrb[11].mxu1 }
 0x134   :  { %v221_v7 = vadd.f32 %v220_v5, %v728_v24  ;;  %v317_v8 = vadd.f32 %v316_v6, %v728_v24 }
 0x135   :  { %384 = vst [vmem:[#allocation7 + $0x28] sm:$0xff] %v219_v3  ;;  %400 = vst [vmem:[#allocation7 + $0xa8] sm:$0xff] %v315_v4 }
 0x136   :  { %416 = vst [vmem:[#allocation8 + $0x28] sm:$0xff] %v221_v7  ;;  %432 = vst [vmem:[#allocation8 + $0xa8] sm:$0xff] %v317_v8  ;;  %v224_v9 = vpop.f32.mrb[12].mxu0  ;;  %v320_v10 = vpop.f32.mrb[12].mxu1 }
 0x137   :  { %v225_v11 = vadd.f32 %v224_v9, %v726_v23  ;;  %v321_v12 = vadd.f32 %v320_v10, %v726_v23  ;;  %v226_v13 = vpop.f32.mrb[13].mxu0  ;;  %v322_v14 = vpop.f32.mrb[13].mxu1 }
 0x138   :  { %v227_v15 = vadd.f32 %v226_v13, %v728_v24  ;;  %v323_v16 = vadd.f32 %v322_v14, %v728_v24 }
 0x139   :  { %385 = vst [vmem:[#allocation7 + $0x30] sm:$0xff] %v225_v11  ;;  %401 = vst [vmem:[#allocation7 + $0xb0] sm:$0xff] %v321_v12 }
 0x13a   :  { %417 = vst [vmem:[#allocation8 + $0x30] sm:$0xff] %v227_v15  ;;  %433 = vst [vmem:[#allocation8 + $0xb0] sm:$0xff] %v323_v16  ;;  %v230_v17 = vpop.f32.mrb[14].mxu0  ;;  %v326_v18 = vpop.f32.mrb[14].mxu1 }
 0x13b   :  { %v231_v19 = vadd.f32 %v230_v17, %v726_v23  ;;  %v327_v20 = vadd.f32 %v326_v18, %v726_v23  ;;  %v232_v21 = vpop.f32.mrb[15].mxu0  ;;  %v328_v22 = vpop.f32.mrb[15].mxu1 }
 0x13c   :  { %v233_v25 = vadd.f32 %v232_v21, %v728_v24  ;;  %v329_v26 = vadd.f32 %v328_v22, %v728_v24 }
 0x13d   :  { %386 = vst [vmem:[#allocation7 + $0x38] sm:$0xff] %v231_v19  ;;  %402 = vst [vmem:[#allocation7 + $0xb8] sm:$0xff] %v327_v20 }
 0x13e   :  { %418 = vst [vmem:[#allocation8 + $0x38] sm:$0xff] %v233_v25  ;;  %434 = vst [vmem:[#allocation8 + $0xb8] sm:$0xff] %v329_v26  ;;  %v236_v0 = vpop.f32.mrb[16].mxu0  ;;  %v332_v27 = vpop.f32.mrb[16].mxu1 }
 0x13f   :  { %v237_v28 = vadd.f32 %v236_v0, %v726_v23  ;;  %v333_v29 = vadd.f32 %v332_v27, %v726_v23  ;;  %v238_v30 = vpop.f32.mrb[17].mxu0  ;;  %v334_v31 = vpop.f32.mrb[17].mxu1 }
 0x140   :  { %v239_v32 = vadd.f32 %v238_v30, %v728_v24  ;;  %v335_v33 = vadd.f32 %v334_v31, %v728_v24 }
 0x141   :  { %387 = vst [vmem:[#allocation7 + $0x40] sm:$0xff] %v237_v28  ;;  %403 = vst [vmem:[#allocation7 + $0xc0] sm:$0xff] %v333_v29 }
 0x142   :  { %419 = vst [vmem:[#allocation8 + $0x40] sm:$0xff] %v239_v32  ;;  %435 = vst [vmem:[#allocation8 + $0xc0] sm:$0xff] %v335_v33  ;;  %v242_v34 = vpop.f32.mrb[18].mxu0  ;;  %v338_v35 = vpop.f32.mrb[18].mxu1 }
 0x143   :  { %v243_v36 = vadd.f32 %v242_v34, %v726_v23  ;;  %v339_v37 = vadd.f32 %v338_v35, %v726_v23  ;;  %v244_v38 = vpop.f32.mrb[19].mxu0  ;;  %v340_v39 = vpop.f32.mrb[19].mxu1 }
 0x144   :  { %v245_v40 = vadd.f32 %v244_v38, %v728_v24  ;;  %v341_v41 = vadd.f32 %v340_v39, %v728_v24 }
 0x145   :  { %388 = vst [vmem:[#allocation7 + $0x48] sm:$0xff] %v243_v36  ;;  %404 = vst [vmem:[#allocation7 + $0xc8] sm:$0xff] %v339_v37 }
 0x146   :  { %420 = vst [vmem:[#allocation8 + $0x48] sm:$0xff] %v245_v40  ;;  %436 = vst [vmem:[#allocation8 + $0xc8] sm:$0xff] %v341_v41  ;;  %v248_v42 = vpop.f32.mrb[20].mxu0  ;;  %v344_v43 = vpop.f32.mrb[20].mxu1 }
 0x147   :  { %v249_v44 = vadd.f32 %v248_v42, %v726_v23  ;;  %v345_v45 = vadd.f32 %v344_v43, %v726_v23  ;;  %v250_v46 = vpop.f32.mrb[21].mxu0  ;;  %v346_v47 = vpop.f32.mrb[21].mxu1 }
 0x148   :  { %v251_v48 = vadd.f32 %v250_v46, %v728_v24  ;;  %v347_v49 = vadd.f32 %v346_v47, %v728_v24 }
 0x149   :  { %389 = vst [vmem:[#allocation7 + $0x50] sm:$0xff] %v249_v44  ;;  %405 = vst [vmem:[#allocation7 + $0xd0] sm:$0xff] %v345_v45 }
 0x14a   :  { %421 = vst [vmem:[#allocation8 + $0x50] sm:$0xff] %v251_v48  ;;  %437 = vst [vmem:[#allocation8 + $0xd0] sm:$0xff] %v347_v49  ;;  %v254_v50 = vpop.f32.mrb[22].mxu0  ;;  %v350_v51 = vpop.f32.mrb[22].mxu1 }
 0x14b   :  { %v255_v52 = vadd.f32 %v254_v50, %v726_v23  ;;  %v351_v53 = vadd.f32 %v350_v51, %v726_v23  ;;  %v256_v54 = vpop.f32.mrb[23].mxu0  ;;  %v352_v55 = vpop.f32.mrb[23].mxu1 }
 0x14c   :  { %v257_v56 = vadd.f32 %v256_v54, %v728_v24  ;;  %v353_v57 = vadd.f32 %v352_v55, %v728_v24 }
 0x14d   :  { %390 = vst [vmem:[#allocation7 + $0x58] sm:$0xff] %v255_v52  ;;  %406 = vst [vmem:[#allocation7 + $0xd8] sm:$0xff] %v351_v53 }
 0x14e   :  { %422 = vst [vmem:[#allocation8 + $0x58] sm:$0xff] %v257_v56  ;;  %438 = vst [vmem:[#allocation8 + $0xd8] sm:$0xff] %v353_v57  ;;  %v260_v58 = vpop.f32.mrb[24].mxu0  ;;  %v356_v59 = vpop.f32.mrb[24].mxu1 }
 0x14f   :  { %v261_v60 = vadd.f32 %v260_v58, %v726_v23  ;;  %v357_v61 = vadd.f32 %v356_v59, %v726_v23  ;;  %v262_v62 = vpop.f32.mrb[25].mxu0  ;;  %v358_v63 = vpop.f32.mrb[25].mxu1 }
 0x150   :  { %v263_v1 = vadd.f32 %v262_v62, %v728_v24  ;;  %v359_v2 = vadd.f32 %v358_v63, %v728_v24 }
 0x151   :  { %391 = vst [vmem:[#allocation7 + $0x60] sm:$0xff] %v261_v60  ;;  %407 = vst [vmem:[#allocation7 + $0xe0] sm:$0xff] %v357_v61 }
 0x152   :  { %423 = vst [vmem:[#allocation8 + $0x60] sm:$0xff] %v263_v1  ;;  %439 = vst [vmem:[#allocation8 + $0xe0] sm:$0xff] %v359_v2  ;;  %v266_v3 = vpop.f32.mrb[26].mxu0  ;;  %v362_v4 = vpop.f32.mrb[26].mxu1 }
 0x153   :  { %v267_v5 = vadd.f32 %v266_v3, %v726_v23  ;;  %v363_v6 = vadd.f32 %v362_v4, %v726_v23  ;;  %v268_v7 = vpop.f32.mrb[27].mxu0  ;;  %v364_v8 = vpop.f32.mrb[27].mxu1 }
 0x154   :  { %v269_v9 = vadd.f32 %v268_v7, %v728_v24  ;;  %v365_v10 = vadd.f32 %v364_v8, %v728_v24 }
 0x155   :  { %392 = vst [vmem:[#allocation7 + $0x68] sm:$0xff] %v267_v5  ;;  %408 = vst [vmem:[#allocation7 + $0xe8] sm:$0xff] %v363_v6 }
 0x156   :  { %424 = vst [vmem:[#allocation8 + $0x68] sm:$0xff] %v269_v9  ;;  %440 = vst [vmem:[#allocation8 + $0xe8] sm:$0xff] %v365_v10  ;;  %v272_v11 = vpop.f32.mrb[28].mxu0  ;;  %v368_v12 = vpop.f32.mrb[28].mxu1 }
 0x157   :  { %v273_v13 = vadd.f32 %v272_v11, %v726_v23  ;;  %v369_v14 = vadd.f32 %v368_v12, %v726_v23  ;;  %v274_v15 = vpop.f32.mrb[29].mxu0  ;;  %v370_v16 = vpop.f32.mrb[29].mxu1 }
 0x158   :  { %v275_v17 = vadd.f32 %v274_v15, %v728_v24  ;;  %v371_v18 = vadd.f32 %v370_v16, %v728_v24 }
 0x159   :  { %393 = vst [vmem:[#allocation7 + $0x70] sm:$0xff] %v273_v13  ;;  %409 = vst [vmem:[#allocation7 + $0xf0] sm:$0xff] %v369_v14 }
 0x15a   :  { %425 = vst [vmem:[#allocation8 + $0x70] sm:$0xff] %v275_v17  ;;  %441 = vst [vmem:[#allocation8 + $0xf0] sm:$0xff] %v371_v18  ;;  %v278_v19 = vpop.f32.mrb[30].mxu0  ;;  %v374_v20 = vpop.f32.mrb[30].mxu1 }
 0x15b   :  { %v279_v21 = vadd.f32 %v278_v19, %v726_v23  ;;  %v375_v22 = vadd.f32 %v374_v20, %v726_v23  ;;  %v280_v25 = vpop.f32.mrb[31].mxu0  ;;  %v376_v26 = vpop.f32.mrb[31].mxu1 }
 0x15c   :  { %v281_v0 = vadd.f32 %v280_v25, %v728_v24  ;;  %v377_v27 = vadd.f32 %v376_v26, %v728_v24 }
 0x15d   :  { %394 = vst [vmem:[#allocation7 + $0x78] sm:$0xff] %v279_v21  ;;  %410 = vst [vmem:[#allocation7 + $0xf8] sm:$0xff] %v375_v22 }
 0x15e   :  { %426 = vst [vmem:[#allocation8 + $0x78] sm:$0xff] %v281_v0  ;;  %442 = vst [vmem:[#allocation8 + $0xf8] sm:$0xff] %v377_v27 }
 0x15f   :  { %589 = shalt.err (!%p586_p6)
}
 0x160   :  { %s590_s23 = scalar_lea.hbm %s834_s3, 4096 }
 0x161   :  { %p591_p7 = scmp.ne.s32.totalorder %s834_s3, %s590_s23  ;;  %p594_p8 = scmp.lt.u32.totalorder %s590_s23, %s834_s3 }
 0x163   :  { %p596_p9 = pnand %p594_p8, %p591_p7 }
 0x165   :  { %599 = shalt.err (!%p596_p9)
}
 0x166   :  { %454 = dma.vmem_to_hbm [thread:$0]  %s449_s17, 4096, %s834_s3, [#allocation4], %s631_s25, %s631_s25, %s632_s26  }
 0x167   :  { %s600_s6 = scalar_lea.vmem %s794_s19, 4096  ;;  %p605_p11 = scmp.lt.s32.totalorder %s794_s19, %s794_s19 }
 0x168   :  { %p601_p10 = scmp.ne.s32.totalorder %s794_s19, %s600_s6  ;;  %p606_p12 = scmp.lt.s32.totalorder %s600_s6, %s600_s6 }
 0x16a   :  { %p607_p13 = por %p606_p12, %p605_p11 }
 0x16c   :  { %p608_p0 = pnand %p607_p13, %p601_p10 }
 0x16e   :  { %611 = shalt.err (!%p608_p0)
}
 0x16f   :  { %s612_s9 = scalar_lea.hbm %s835_s4, 4096 }
 0x170   :  { %p613_p1 = scmp.ne.s32.totalorder %s835_s4, %s612_s9  ;;  %p616_p2 = scmp.lt.u32.totalorder %s612_s9, %s835_s4 }
 0x172   :  { %p618_p3 = pnand %p616_p2, %p613_p1 }
 0x174   :  { %621 = shalt.err (!%p618_p3)
}
 0x175   :  { %466 = dma.vmem_to_hbm [thread:$0]  %s794_s19, 4096, %s835_s4, [#allocation9], %s631_s25, %s631_s25, %s632_s26  }
 0x176   :  { %626 = dma.done.wait [#allocation4], 4096  }
 0x177   :  { %627 = vsyncadd [#allocation4], 4294963200 }
 0x178   :  { %628 = dma.done.wait [#allocation9], 4096  }
 0x179   :  { %629 = vsyncadd [#allocation9], 4294963200 }
 0x17a   :  { %473 = vsyncpa [#allocation3], 1 }
 0x17b   :  { %474 = vsyncpa [#allocation6], 1 }
 0x17c   :  { %475 = vsyncpa [#allocation4], 1 }
 0x17d   :  { %476 = vsyncpa [#allocation9], 1 }

</bundles_post_ra>
